<compile_context>
chip_gen: v5e
topology: v5e:2x2
jax: 0.10.0
libtpu: 0.0.40
codegen_flags: <defaults>
</compile_context>

<pallas_src>
import math
import functools

import jax
import jax.numpy as jnp
from jax import lax
from jax.experimental import pallas as pl
from jax.experimental.pallas import tpu as pltpu


def _tself_attention_kernel(v_ref, k_ref, q_ref,
                            wv_ref, wk_ref, wq_ref, wo_ref, bo_ref,
                            o_ref, ctx_ref,
                            *, heads, head_dim, scale, compute_dtype):
    cd = compute_dtype

    # Current tiles: K/V carry the full sequence, Q/O carry one q-tile.
    v = v_ref[0].astype(cd)          # (T,  C)
    k = k_ref[0].astype(cd)          # (T,  C)
    q = q_ref[0].astype(cd)          # (TQ, C)

    wv = wv_ref[...]                 # (C, C) block-diag kron(I_H, Wv.T), compute dtype
    wk = wk_ref[...]
    wq = wq_ref[...]
    wo = wo_ref[...]                 # (C, C) = fc_out.weight.T, compute dtype
    bo = bo_ref[0]                   # (C,)   f32

    # Fused, lane-dense per-head projections: one (T,C)@(C,C) each (full MXU width).
    vproj = jnp.dot(v, wv, preferred_element_type=jnp.float32)   # (T,  C) f32
    kproj = jnp.dot(k, wk, preferred_element_type=jnp.float32)   # (T,  C) f32
    qproj = jnp.dot(q, wq, preferred_element_type=jnp.float32)   # (TQ, C) f32

    # a @ b.T without materializing a transpose.
    nt_dims = (((1,), (1,)), ((), ()))

    for h in range(heads):           # heads is small & static; per-head temporaries
        lo = h * head_dim            # die each iteration (consumed by ctx_ref store).
        hi = lo + head_dim
        qh = qproj[:, lo:hi].astype(cd)   # (TQ, D)
        kh = kproj[:, lo:hi].astype(cd)   # (T,  D)
        vh = vproj[:, lo:hi].astype(cd)   # (T,  D)

        energy = lax.dot_general(qh, kh, nt_dims,
                                 preferred_element_type=jnp.float32) * scale   # (TQ, T)
        energy = energy - jnp.max(energy, axis=-1, keepdims=True)              # f32 softmax
        p = jnp.exp(energy)
        inv = pl.reciprocal(jnp.sum(p, axis=-1, keepdims=True), approx=True)   # EUP
        attn = (p * inv).astype(cd)                                            # (TQ, T)

        ctx_ref[:, lo:hi] = jnp.dot(attn, vh,
                                    preferred_element_type=jnp.float32)        # (TQ, D) f32

    # fc_out over the concatenated heads: single lane-dense (TQ,C)@(C,C) + bias.
    out = jnp.dot(ctx_ref[...].astype(cd), wo,
                  preferred_element_type=jnp.float32) + bo
    o_ref[0] = out.astype(o_ref.dtype)


def tself_attention(values, keys, query, wv, wk, wq, wo, bo, *, heads,
                    compute_dtype=jnp.bfloat16, q_tile=512):
    N, T, C = query.shape
    D = C // heads
    assert D * heads == C, "embed_size must be divisible by heads"

    # One-time host/XLA-side weight preparation (outside the grid):
    #   block-diagonal projection weights -> kernel does a single (T,C)@(C,C)
    #   matmul per tensor; all transposes folded here so the kernel has none.
    eye_h = jnp.eye(heads, dtype=wv.dtype)
    wv_bd = jnp.kron(eye_h, wv.T).astype(compute_dtype)   # (C, C)
    wk_bd = jnp.kron(eye_h, wk.T).astype(compute_dtype)   # (C, C)
    wq_bd = jnp.kron(eye_h, wq.T).astype(compute_dtype)   # (C, C)
    wo_t = wo.T.astype(compute_dtype)                     # (C, C)
    bo2 = bo.reshape(1, C).astype(jnp.float32)            # (1, C)

    # Q-tiling: full sequence if small, else 512-row q-tiles (multiple of 8).
    tq = T if T <= q_tile else q_tile
    n_qt = pl.cdiv(T, tq)

    kernel = functools.partial(_tself_attention_kernel,
                               heads=heads, head_dim=D,
                               scale=1.0 / math.sqrt(C),
                               compute_dtype=compute_dtype)

    return pl.pallas_call(
        kernel,
        out_shape=jax.ShapeDtypeStruct((N, T, C), query.dtype),
        grid=(N, n_qt),
        in_specs=[
            pl.BlockSpec((1, T, C), lambda n, t: (n, 0, 0)),    # values (full seq, resident per n)
            pl.BlockSpec((1, T, C), lambda n, t: (n, 0, 0)),    # keys   (full seq, resident per n)
            pl.BlockSpec((1, tq, C), lambda n, t: (n, t, 0)),   # query tile
            pl.BlockSpec((C, C), lambda n, t: (0, 0)),          # block-diag W_values
            pl.BlockSpec((C, C), lambda n, t: (0, 0)),          # block-diag W_keys
            pl.BlockSpec((C, C), lambda n, t: (0, 0)),          # block-diag W_queries
            pl.BlockSpec((C, C), lambda n, t: (0, 0)),          # fc_out weight (pre-transposed)
            pl.BlockSpec((1, C), lambda n, t: (0, 0)),          # fc_out bias
        ],
        out_specs=pl.BlockSpec((1, tq, C), lambda n, t: (n, t, 0)),
        scratch_shapes=[pltpu.VMEM((tq, C), jnp.float32)],      # concatenated head context
        compiler_params=pltpu.CompilerParams(
            dimension_semantics=("parallel", "parallel"),
            vmem_limit_bytes=64 * 1024 * 1024),
    )(values, keys, query, wv_bd, wk_bd, wq_bd, wo_t, bo2)


def _reference(values, keys, query, wv, wk, wq, wo, bo, *, heads):
    # Pure-JAX reference mirroring the PyTorch forward exactly (f32).
    N, T, C = query.shape
    D = C // heads
    v = values.reshape(N, T, heads, D)
    k = keys.reshape(N, T, heads, D)
    q = query.reshape(N, T, heads, D)
    v = jnp.einsum('nthd,ed->nthe', v, wv)
    k = jnp.einsum('nthd,ed->nthe', k, wk)
    q = jnp.einsum('nthd,ed->nthe', q, wq)
    energy = jnp.einsum('nqhd,nkhd->nqkh', q, k)
    attn = jax.nn.softmax(energy / math.sqrt(C), axis=2)
    out = jnp.einsum('nqkh,nkhd->nqhd', attn, v).reshape(N, T, C)
    return jnp.einsum('ntc,ec->nte', out, wo) + bo


if __name__ == "__main__":
    N, T = 2, 8
    embed_size, heads = 32, 4
    head_dim = embed_size // heads

    key = jax.random.PRNGKey(0)
    k_v, k_k, k_q, k_wv, k_wk, k_wq, k_wo, k_bo = jax.random.split(key, 8)

    values = jax.random.normal(k_v, (N, T, embed_size), jnp.float32)
    keys_in = jax.random.normal(k_k, (N, T, embed_size), jnp.float32)
    query = jax.random.normal(k_q, (N, T, embed_size), jnp.float32)

    # Deterministic "Linear"-style init (uniform in +/- 1/sqrt(fan_in)).
    def uinit(k, shape, fan_in):
        bound = 1.0 / math.sqrt(fan_in)
        return jax.random.uniform(k, shape, jnp.float32, -bound, bound)

    wv = uinit(k_wv, (head_dim, head_dim), head_dim)
    wk = uinit(k_wk, (head_dim, head_dim), head_dim)
    wq = uinit(k_wq, (head_dim, head_dim), head_dim)
    wo = uinit(k_wo, (embed_size, embed_size), embed_size)
    bo = uinit(k_bo, (embed_size,), embed_size)

    ref = _reference(values, keys_in, query, wv, wk, wq, wo, bo, heads=heads)

    # 1) f32 compute path: tight check (only approx reciprocal deviates from ref).
    out_f32 = tself_attention(values, keys_in, query, wv, wk, wq, wo, bo,
                              heads=heads, compute_dtype=jnp.float32)
    out_f32 = jax.block_until_ready(out_f32)
    assert out_f32.shape == (N, T, embed_size)
    assert jnp.allclose(out_f32, ref, atol=1e-2, rtol=1e-2), "f32 kernel mismatch vs reference"

    # 2) Default bf16 matmul-operand path (MXU-rate); f32 accumulation + f32 softmax.
    out_bf16 = tself_attention(values, keys_in, query, wv, wk, wq, wo, bo, heads=heads)
    out_bf16 = jax.block_until_ready(out_bf16)
    assert out_bf16.shape == (N, T, embed_size)
    assert jnp.allclose(out_bf16, ref, atol=5e-2, rtol=5e-2), "bf16 kernel mismatch vs reference"

    print("KERNEL_OK")
</pallas_src>

<mosaic_0001>
module attributes {stable_mosaic.version = 11 : i64} {
  func.func @_tself_attention_kernel(%arg0: i32, %arg1: i32, %arg2: memref<1x8x32xf32, #tpu.memory_space<vmem>>, %arg3: memref<1x8x32xf32, #tpu.memory_space<vmem>>, %arg4: memref<1x8x32xf32, #tpu.memory_space<vmem>>, %arg5: memref<32x32xf32, #tpu.memory_space<vmem>>, %arg6: memref<32x32xf32, #tpu.memory_space<vmem>>, %arg7: memref<32x32xf32, #tpu.memory_space<vmem>>, %arg8: memref<32x32xf32, #tpu.memory_space<vmem>>, %arg9: memref<1x32xf32, #tpu.memory_space<vmem>>, %arg10: memref<1x8x32xf32, #tpu.memory_space<vmem>>, %arg11: memref<8x32xf32, #tpu.memory_space<vmem>>) attributes {dimension_semantics = [#tpu.dimension_semantics<parallel>, #tpu.dimension_semantics<parallel>], iteration_bounds = array<i64: 2, 1>, scalar_prefetch = 0 : i64, scratch_operands = 1 : i64, tpu.core_type = #tpu.core_type<tc>, window_params = [{transform_indices = @transform_0, window_bounds = array<i64: 1, 8, 32>}, {transform_indices = @transform_1, window_bounds = array<i64: 1, 8, 32>}, {transform_indices = @transform_2, window_bounds = array<i64: 1, 8, 32>}, {pipeline_mode = #tpu.pipeline_mode<synchronous>, transform_indices = @transform_3, window_bounds = array<i64: 32, 32>}, {pipeline_mode = #tpu.pipeline_mode<synchronous>, transform_indices = @transform_4, window_bounds = array<i64: 32, 32>}, {pipeline_mode = #tpu.pipeline_mode<synchronous>, transform_indices = @transform_5, window_bounds = array<i64: 32, 32>}, {pipeline_mode = #tpu.pipeline_mode<synchronous>, transform_indices = @transform_6, window_bounds = array<i64: 32, 32>}, {pipeline_mode = #tpu.pipeline_mode<synchronous>, transform_indices = @transform_7, window_bounds = array<i64: 1, 32>}, {transform_indices = @transform_8, window_bounds = array<i64: 1, 8, 32>}]} {
    %c0 = arith.constant 0 : index
    %c0_0 = arith.constant 0 : index
    %c0_1 = arith.constant 0 : index
    %0 = vector.load %arg2[%c0, %c0_0, %c0_1] : memref<1x8x32xf32, #tpu.memory_space<vmem>>, vector<1x8x32xf32>
    %1 = vector.shape_cast %0 : vector<1x8x32xf32> to vector<8x32xf32>
    %c0_2 = arith.constant 0 : index
    %c0_3 = arith.constant 0 : index
    %c0_4 = arith.constant 0 : index
    %2 = vector.load %arg3[%c0_2, %c0_3, %c0_4] : memref<1x8x32xf32, #tpu.memory_space<vmem>>, vector<1x8x32xf32>
    %3 = vector.shape_cast %2 : vector<1x8x32xf32> to vector<8x32xf32>
    %c0_5 = arith.constant 0 : index
    %c0_6 = arith.constant 0 : index
    %c0_7 = arith.constant 0 : index
    %4 = vector.load %arg4[%c0_5, %c0_6, %c0_7] : memref<1x8x32xf32, #tpu.memory_space<vmem>>, vector<1x8x32xf32>
    %5 = vector.shape_cast %4 : vector<1x8x32xf32> to vector<8x32xf32>
    %c0_8 = arith.constant 0 : index
    %c0_9 = arith.constant 0 : index
    %6 = vector.load %arg5[%c0_8, %c0_9] : memref<32x32xf32, #tpu.memory_space<vmem>>, vector<32x32xf32>
    %c0_10 = arith.constant 0 : index
    %c0_11 = arith.constant 0 : index
    %7 = vector.load %arg6[%c0_10, %c0_11] : memref<32x32xf32, #tpu.memory_space<vmem>>, vector<32x32xf32>
    %c0_12 = arith.constant 0 : index
    %c0_13 = arith.constant 0 : index
    %8 = vector.load %arg7[%c0_12, %c0_13] : memref<32x32xf32, #tpu.memory_space<vmem>>, vector<32x32xf32>
    %c0_14 = arith.constant 0 : index
    %c0_15 = arith.constant 0 : index
    %9 = vector.load %arg8[%c0_14, %c0_15] : memref<32x32xf32, #tpu.memory_space<vmem>>, vector<32x32xf32>
    %c0_16 = arith.constant 0 : index
    %c0_17 = arith.constant 0 : index
    %10 = vector.load %arg9[%c0_16, %c0_17] : memref<1x32xf32, #tpu.memory_space<vmem>>, vector<1x32xf32>
    %11 = vector.shape_cast %10 : vector<1x32xf32> to vector<32xf32>
    %cst = arith.constant dense<0.000000e+00> : vector<8x32xf32>
    %12 = tpu.matmul %1, %6, %cst {dimension_numbers = #tpu.dot_dimension_numbers<[1], [0], [0], [1], [0, 0, 1, 1], [], []>} : vector<8x32xf32>, vector<32x32xf32>, vector<8x32xf32> -> vector<8x32xf32>
    %cst_18 = arith.constant dense<0.000000e+00> : vector<8x32xf32>
    %13 = tpu.matmul %3, %7, %cst_18 {dimension_numbers = #tpu.dot_dimension_numbers<[1], [0], [0], [1], [0, 0, 1, 1], [], []>} : vector<8x32xf32>, vector<32x32xf32>, vector<8x32xf32> -> vector<8x32xf32>
    %cst_19 = arith.constant dense<0.000000e+00> : vector<8x32xf32>
    %14 = tpu.matmul %5, %8, %cst_19 {dimension_numbers = #tpu.dot_dimension_numbers<[1], [0], [0], [1], [0, 0, 1, 1], [], []>} : vector<8x32xf32>, vector<32x32xf32>, vector<8x32xf32> -> vector<8x32xf32>
    %15 = vector.extract_strided_slice %14 {offsets = [0, 0], sizes = [8, 8], strides = [1, 1]} : vector<8x32xf32> to vector<8x8xf32>
    %16 = vector.extract_strided_slice %13 {offsets = [0, 0], sizes = [8, 8], strides = [1, 1]} : vector<8x32xf32> to vector<8x8xf32>
    %17 = vector.extract_strided_slice %12 {offsets = [0, 0], sizes = [8, 8], strides = [1, 1]} : vector<8x32xf32> to vector<8x8xf32>
    %cst_20 = arith.constant dense<0.000000e+00> : vector<8x8xf32>
    %18 = tpu.matmul %15, %16, %cst_20 {dimension_numbers = #tpu.dot_dimension_numbers<[1], [1], [0], [0], [0, 0, 1, 0], [], []>} : vector<8x8xf32>, vector<8x8xf32>, vector<8x8xf32> -> vector<8x8xf32>
    %cst_21 = arith.constant 0.176776692 : f32
    %19 = vector.broadcast %cst_21 : f32 to vector<8x8xf32>
    %20 = arith.mulf %18, %19 : vector<8x8xf32>
    %cst_22 = arith.constant dense<0xFF800000> : vector<8xf32>
    %21 = vector.multi_reduction <maximumf>, %20, %cst_22 [1] : vector<8x8xf32> to vector<8xf32>
    %22 = vector.shape_cast %21 : vector<8xf32> to vector<8x1xf32>
    %23 = vector.broadcast %22 : vector<8x1xf32> to vector<8x8xf32>
    %24 = arith.subf %20, %23 : vector<8x8xf32>
    %25 = math.exp %24 : vector<8x8xf32>
    %cst_23 = arith.constant dense<0.000000e+00> : vector<8xf32>
    %26 = vector.multi_reduction <add>, %25, %cst_23 [1] : vector<8x8xf32> to vector<8xf32>
    %27 = vector.shape_cast %26 : vector<8xf32> to vector<8x1xf32>
    %28 = tpu.reciprocal %27 {approx = true} : vector<8x1xf32> -> vector<8x1xf32>
    %29 = vector.broadcast %28 : vector<8x1xf32> to vector<8x8xf32>
    %30 = arith.mulf %25, %29 : vector<8x8xf32>
    %cst_24 = arith.constant dense<0.000000e+00> : vector<8x8xf32>
    %31 = tpu.matmul %30, %17, %cst_24 {dimension_numbers = #tpu.dot_dimension_numbers<[1], [0], [0], [1], [0, 0, 1, 1], [], []>} : vector<8x8xf32>, vector<8x8xf32>, vector<8x8xf32> -> vector<8x8xf32>
    %c0_25 = arith.constant 0 : index
    %c0_26 = arith.constant 0 : index
    %32 = vector.load %arg11[%c0_25, %c0_26] : memref<8x32xf32, #tpu.memory_space<vmem>>, vector<8x8xf32>
    tpu.vector_store %arg11[%c0_25, %c0_26], %31 {strides = array<i32>} : memref<8x32xf32, #tpu.memory_space<vmem>>, vector<8x8xf32>,
    %33 = vector.extract_strided_slice %14 {offsets = [0, 8], sizes = [8, 8], strides = [1, 1]} : vector<8x32xf32> to vector<8x8xf32>
    %34 = vector.extract_strided_slice %13 {offsets = [0, 8], sizes = [8, 8], strides = [1, 1]} : vector<8x32xf32> to vector<8x8xf32>
    %35 = vector.extract_strided_slice %12 {offsets = [0, 8], sizes = [8, 8], strides = [1, 1]} : vector<8x32xf32> to vector<8x8xf32>
    %cst_27 = arith.constant dense<0.000000e+00> : vector<8x8xf32>
    %36 = tpu.matmul %33, %34, %cst_27 {dimension_numbers = #tpu.dot_dimension_numbers<[1], [1], [0], [0], [0, 0, 1, 0], [], []>} : vector<8x8xf32>, vector<8x8xf32>, vector<8x8xf32> -> vector<8x8xf32>
    %cst_28 = arith.constant 0.176776692 : f32
    %37 = vector.broadcast %cst_28 : f32 to vector<8x8xf32>
    %38 = arith.mulf %36, %37 : vector<8x8xf32>
    %cst_29 = arith.constant dense<0xFF800000> : vector<8xf32>
    %39 = vector.multi_reduction <maximumf>, %38, %cst_29 [1] : vector<8x8xf32> to vector<8xf32>
    %40 = vector.shape_cast %39 : vector<8xf32> to vector<8x1xf32>
    %41 = vector.broadcast %40 : vector<8x1xf32> to vector<8x8xf32>
    %42 = arith.subf %38, %41 : vector<8x8xf32>
    %43 = math.exp %42 : vector<8x8xf32>
    %cst_30 = arith.constant dense<0.000000e+00> : vector<8xf32>
    %44 = vector.multi_reduction <add>, %43, %cst_30 [1] : vector<8x8xf32> to vector<8xf32>
    %45 = vector.shape_cast %44 : vector<8xf32> to vector<8x1xf32>
    %46 = tpu.reciprocal %45 {approx = true} : vector<8x1xf32> -> vector<8x1xf32>
    %47 = vector.broadcast %46 : vector<8x1xf32> to vector<8x8xf32>
    %48 = arith.mulf %43, %47 : vector<8x8xf32>
    %cst_31 = arith.constant dense<0.000000e+00> : vector<8x8xf32>
    %49 = tpu.matmul %48, %35, %cst_31 {dimension_numbers = #tpu.dot_dimension_numbers<[1], [0], [0], [1], [0, 0, 1, 1], [], []>} : vector<8x8xf32>, vector<8x8xf32>, vector<8x8xf32> -> vector<8x8xf32>
    %c0_32 = arith.constant 0 : index
    %c8 = arith.constant 8 : index
    %50 = vector.load %arg11[%c0_32, %c8] : memref<8x32xf32, #tpu.memory_space<vmem>>, vector<8x8xf32>
    tpu.vector_store %arg11[%c0_32, %c8], %49 {strides = array<i32>} : memref<8x32xf32, #tpu.memory_space<vmem>>, vector<8x8xf32>,
    %51 = vector.extract_strided_slice %14 {offsets = [0, 16], sizes = [8, 8], strides = [1, 1]} : vector<8x32xf32> to vector<8x8xf32>
    %52 = vector.extract_strided_slice %13 {offsets = [0, 16], sizes = [8, 8], strides = [1, 1]} : vector<8x32xf32> to vector<8x8xf32>
    %53 = vector.extract_strided_slice %12 {offsets = [0, 16], sizes = [8, 8], strides = [1, 1]} : vector<8x32xf32> to vector<8x8xf32>
    %cst_33 = arith.constant dense<0.000000e+00> : vector<8x8xf32>
    %54 = tpu.matmul %51, %52, %cst_33 {dimension_numbers = #tpu.dot_dimension_numbers<[1], [1], [0], [0], [0, 0, 1, 0], [], []>} : vector<8x8xf32>, vector<8x8xf32>, vector<8x8xf32> -> vector<8x8xf32>
    %cst_34 = arith.constant 0.176776692 : f32
    %55 = vector.broadcast %cst_34 : f32 to vector<8x8xf32>
    %56 = arith.mulf %54, %55 : vector<8x8xf32>
    %cst_35 = arith.constant dense<0xFF800000> : vector<8xf32>
    %57 = vector.multi_reduction <maximumf>, %56, %cst_35 [1] : vector<8x8xf32> to vector<8xf32>
    %58 = vector.shape_cast %57 : vector<8xf32> to vector<8x1xf32>
    %59 = vector.broadcast %58 : vector<8x1xf32> to vector<8x8xf32>
    %60 = arith.subf %56, %59 : vector<8x8xf32>
    %61 = math.exp %60 : vector<8x8xf32>
    %cst_36 = arith.constant dense<0.000000e+00> : vector<8xf32>
    %62 = vector.multi_reduction <add>, %61, %cst_36 [1] : vector<8x8xf32> to vector<8xf32>
    %63 = vector.shape_cast %62 : vector<8xf32> to vector<8x1xf32>
    %64 = tpu.reciprocal %63 {approx = true} : vector<8x1xf32> -> vector<8x1xf32>
    %65 = vector.broadcast %64 : vector<8x1xf32> to vector<8x8xf32>
    %66 = arith.mulf %61, %65 : vector<8x8xf32>
    %cst_37 = arith.constant dense<0.000000e+00> : vector<8x8xf32>
    %67 = tpu.matmul %66, %53, %cst_37 {dimension_numbers = #tpu.dot_dimension_numbers<[1], [0], [0], [1], [0, 0, 1, 1], [], []>} : vector<8x8xf32>, vector<8x8xf32>, vector<8x8xf32> -> vector<8x8xf32>
    %c0_38 = arith.constant 0 : index
    %c16 = arith.constant 16 : index
    %68 = vector.load %arg11[%c0_38, %c16] : memref<8x32xf32, #tpu.memory_space<vmem>>, vector<8x8xf32>
    tpu.vector_store %arg11[%c0_38, %c16], %67 {strides = array<i32>} : memref<8x32xf32, #tpu.memory_space<vmem>>, vector<8x8xf32>,
    %69 = vector.extract_strided_slice %14 {offsets = [0, 24], sizes = [8, 8], strides = [1, 1]} : vector<8x32xf32> to vector<8x8xf32>
    %70 = vector.extract_strided_slice %13 {offsets = [0, 24], sizes = [8, 8], strides = [1, 1]} : vector<8x32xf32> to vector<8x8xf32>
    %71 = vector.extract_strided_slice %12 {offsets = [0, 24], sizes = [8, 8], strides = [1, 1]} : vector<8x32xf32> to vector<8x8xf32>
    %cst_39 = arith.constant dense<0.000000e+00> : vector<8x8xf32>
    %72 = tpu.matmul %69, %70, %cst_39 {dimension_numbers = #tpu.dot_dimension_numbers<[1], [1], [0], [0], [0, 0, 1, 0], [], []>} : vector<8x8xf32>, vector<8x8xf32>, vector<8x8xf32> -> vector<8x8xf32>
    %cst_40 = arith.constant 0.176776692 : f32
    %73 = vector.broadcast %cst_40 : f32 to vector<8x8xf32>
    %74 = arith.mulf %72, %73 : vector<8x8xf32>
    %cst_41 = arith.constant dense<0xFF800000> : vector<8xf32>
    %75 = vector.multi_reduction <maximumf>, %74, %cst_41 [1] : vector<8x8xf32> to vector<8xf32>
    %76 = vector.shape_cast %75 : vector<8xf32> to vector<8x1xf32>
    %77 = vector.broadcast %76 : vector<8x1xf32> to vector<8x8xf32>
    %78 = arith.subf %74, %77 : vector<8x8xf32>
    %79 = math.exp %78 : vector<8x8xf32>
    %cst_42 = arith.constant dense<0.000000e+00> : vector<8xf32>
    %80 = vector.multi_reduction <add>, %79, %cst_42 [1] : vector<8x8xf32> to vector<8xf32>
    %81 = vector.shape_cast %80 : vector<8xf32> to vector<8x1xf32>
    %82 = tpu.reciprocal %81 {approx = true} : vector<8x1xf32> -> vector<8x1xf32>
    %83 = vector.broadcast %82 : vector<8x1xf32> to vector<8x8xf32>
    %84 = arith.mulf %79, %83 : vector<8x8xf32>
    %cst_43 = arith.constant dense<0.000000e+00> : vector<8x8xf32>
    %85 = tpu.matmul %84, %71, %cst_43 {dimension_numbers = #tpu.dot_dimension_numbers<[1], [0], [0], [1], [0, 0, 1, 1], [], []>} : vector<8x8xf32>, vector<8x8xf32>, vector<8x8xf32> -> vector<8x8xf32>
    %c0_44 = arith.constant 0 : index
    %c24 = arith.constant 24 : index
    %86 = vector.load %arg11[%c0_44, %c24] : memref<8x32xf32, #tpu.memory_space<vmem>>, vector<8x8xf32>
    tpu.vector_store %arg11[%c0_44, %c24], %85 {strides = array<i32>} : memref<8x32xf32, #tpu.memory_space<vmem>>, vector<8x8xf32>,
    %c0_45 = arith.constant 0 : index
    %c0_46 = arith.constant 0 : index
    %87 = vector.load %arg11[%c0_45, %c0_46] : memref<8x32xf32, #tpu.memory_space<vmem>>, vector<8x32xf32>
    %cst_47 = arith.constant dense<0.000000e+00> : vector<8x32xf32>
    %88 = tpu.matmul %87, %9, %cst_47 {dimension_numbers = #tpu.dot_dimension_numbers<[1], [0], [0], [1], [0, 0, 1, 1], [], []>} : vector<8x32xf32>, vector<32x32xf32>, vector<8x32xf32> -> vector<8x32xf32>
    %89 = vector.shape_cast %11 : vector<32xf32> to vector<1x32xf32>
    %90 = vector.broadcast %89 : vector<1x32xf32> to vector<8x32xf32>
    %91 = arith.addf %88, %90 : vector<8x32xf32>
    %c0_48 = arith.constant 0 : index
    %c0_49 = arith.constant 0 : index
    %c0_50 = arith.constant 0 : index
    %92 = vector.load %arg10[%c0_48, %c0_49, %c0_50] : memref<1x8x32xf32, #tpu.memory_space<vmem>>, vector<1x8x32xf32>
    %93 = vector.shape_cast %92 : vector<1x8x32xf32> to vector<8x32xf32>
    %94 = vector.shape_cast %91 : vector<8x32xf32> to vector<1x8x32xf32>
    tpu.vector_store %arg10[%c0_48, %c0_49, %c0_50], %94 {strides = array<i32>} : memref<1x8x32xf32, #tpu.memory_space<vmem>>, vector<1x8x32xf32>,
    return
  }
  func.func @transform_0(%arg0: i32, %arg1: i32) -> (i32, i32, i32) {
    %c0_i32 = arith.constant 0 : i32
    %c0_i32_0 = arith.constant 0 : i32
    %c0_i32_1 = arith.constant 0 : i32
    return %arg0, %c0_i32, %c0_i32_0 : i32, i32, i32
  }
  func.func @transform_1(%arg0: i32, %arg1: i32) -> (i32, i32, i32) {
    %c0_i32 = arith.constant 0 : i32
    %c0_i32_0 = arith.constant 0 : i32
    %c0_i32_1 = arith.constant 0 : i32
    return %arg0, %c0_i32, %c0_i32_0 : i32, i32, i32
  }
  func.func @transform_2(%arg0: i32, %arg1: i32) -> (i32, i32, i32) {
    %c0_i32 = arith.constant 0 : i32
    %c0_i32_0 = arith.constant 0 : i32
    return %arg0, %arg1, %c0_i32 : i32, i32, i32
  }
  func.func @transform_3(%arg0: i32, %arg1: i32) -> (i32, i32) {
    %c0_i32 = arith.constant 0 : i32
    %c0_i32_0 = arith.constant 0 : i32
    %c0_i32_1 = arith.constant 0 : i32
    return %c0_i32, %c0_i32_0 : i32, i32
  }
  func.func @transform_4(%arg0: i32, %arg1: i32) -> (i32, i32) {
    %c0_i32 = arith.constant 0 : i32
    %c0_i32_0 = arith.constant 0 : i32
    %c0_i32_1 = arith.constant 0 : i32
    return %c0_i32, %c0_i32_0 : i32, i32
  }
  func.func @transform_5(%arg0: i32, %arg1: i32) -> (i32, i32) {
    %c0_i32 = arith.constant 0 : i32
    %c0_i32_0 = arith.constant 0 : i32
    %c0_i32_1 = arith.constant 0 : i32
    return %c0_i32, %c0_i32_0 : i32, i32
  }
  func.func @transform_6(%arg0: i32, %arg1: i32) -> (i32, i32) {
    %c0_i32 = arith.constant 0 : i32
    %c0_i32_0 = arith.constant 0 : i32
    %c0_i32_1 = arith.constant 0 : i32
    return %c0_i32, %c0_i32_0 : i32, i32
  }
  func.func @transform_7(%arg0: i32, %arg1: i32) -> (i32, i32) {
    %c0_i32 = arith.constant 0 : i32
    %c0_i32_0 = arith.constant 0 : i32
    %c0_i32_1 = arith.constant 0 : i32
    return %c0_i32, %c0_i32_0 : i32, i32
  }
  func.func @transform_8(%arg0: i32, %arg1: i32) -> (i32, i32, i32) {
    %c0_i32 = arith.constant 0 : i32
    %c0_i32_0 = arith.constant 0 : i32
    return %arg0, %arg1, %c0_i32 : i32, i32, i32
  }
}

</mosaic_0001>

<bundles_post_ra>
// kernel: tpu_custom_call.1
= control target key start
LH: loop header
LB: loop body
LE: loop exit
PB: predicated region body
PF: predicated region fallthrough
CT: control target
= control target key end

     0   :  { %s1863_s0 = inlined_call_operand.hbm [shape: f32[2,8,32], index: 0, kind: input, shape index: {}]   ;;  %s1864_s1 = inlined_call_operand.hbm [shape: f32[2,8,32], index: 1, kind: input, shape index: {}]   ;;  %s1865_s2 = inlined_call_operand.hbm [shape: f32[2,8,32], index: 2, kind: input, shape index: {}]   ;;  %s1866_s3 = inlined_call_operand.hbm [shape: f32[32,32], index: 3, kind: input, shape index: {}]   ;;  %s1867_s4 = inlined_call_operand.hbm [shape: f32[32,32], index: 4, kind: input, shape index: {}]   ;;  %s1868_s5 = inlined_call_operand.hbm [shape: f32[32,32], index: 5, kind: input, shape index: {}]   ;;  %s1869_s6 = inlined_call_operand.hbm [shape: f32[32,32], index: 6, kind: input, shape index: {}]   ;;  %s1870_s7 = inlined_call_operand.vmem [shape: f32[1,32], index: 7, kind: input, shape index: {}]   ;;  %s1871_s8 = inlined_call_operand.hbm [shape: f32[2,8,32], index: 8, kind: output, shape index: {}]  }
   0x1   :  { %1882 = sst [smem:[#allocation26_spill]] %s1863_s0 }
   0x2   :  { %1883 = sst [smem:[#allocation27_spill]] %s1864_s1 }
   0x3   :  { %1884 = sst [smem:[#allocation28_spill]] %s1866_s3 }
   0x4   :  { %1885 = sst [smem:[#allocation29_spill]] %s1867_s4 }
   0x5   :  { %1886 = sst [smem:[#allocation30_spill]] %s1868_s5 }
   0x6   :  { %1887 = sst [smem:[#allocation31_spill]] %s1869_s6 }
   0x7   :  { %13 = vsyncpa [#allocation4], 0 }
   0x8   :  { %15 = vsyncpa [#allocation4 + $0x1], 0 }
   0x9   :  { %16 = vsyncpa [#allocation7], 0 }
   0xa   :  { %18 = vsyncpa [#allocation7 + $0x1], 0 }
   0xb   :  { %19 = vsyncpa [#allocation10], 0 }
   0xc   :  { %20 = vsyncpa [#allocation13], 0 }
   0xd   :  { %21 = vsyncpa [#allocation5], 0 }
   0xe   :  { %23 = vsyncpa [#allocation5 + $0x1], 0  ;;  %s1601_s27 = smov 0   ;;  %s1603_s28 = smov 0  }
   0xf   :  { %s1605_s29 = smov 0   ;;  %s1607_s30 = smov 0  }
  0x10   :  { %s1609_s9 = smov 0   ;;  %s1611_s10 = smov 0  }
  0x11 LB: > { %1888 = sst [smem:[#allocation21_spill]] %s1538_s9  ;;  %s1632_s11 = sadd.s32 4294967295, %s1542_s10   ;;  %s1542_s10 = sphi %s1611_s10, %s29_s10   ;;  %s1538_s9 = sphi %s1609_s9, %s1913_s9   ;;  %s1534_s30 = sphi %s1607_s30, %s1912_s30   ;;  %s1530_s29 = sphi %s1605_s29, %s1916_s29   ;;  %s1526_s28 = sphi %s1603_s28, %s1915_s28   ;;  %s1522_s27 = sphi %s1601_s27, %s1914_s27  }
  0x12   : > { %1889 = sst [smem:[#allocation22_spill]] %s1542_s10  ;;  %p1059_p0 = scmp.ge.s32.totalorder %s1542_s10, 1 }
  0x13   : > { %p62_p1 = scmp.eq.s32.totalorder %s1632_s11, 0  ;;  %p259_p2 = scmp.lt.s32.totalorder %s1542_s10, 3 }
  0x14   : > { %s1890_s3 = sld [smem:[#allocation28_spill]]  ;;  %s1544_s16 = smov [#allocation9]  }
  0x15   : > { %p1640_p3 = pnand %p1059_p0, %p259_p2  ;;  %s272_s17 = sshll.u32 %s1544_s16, 4  ;;  %s273_s17 = int_to_ptr.vmem [resolvable:$true] %s272_s17 }
  0x16   : > { %p1064_p6 = scmp.ge.s32.totalorder %s1542_s10, 2  ;;  %s1893_s5 = sld [smem:[#allocation30_spill]] }
  0x17   : > { %p1124_p4 = pneg %p1640_p3  ;;  %s1872_s22 = smov 128  }
  0x18   : > { %s1874_s23 = smov 8   ;;  %s1547_s24 = smov [#allocation12]  }
  0x19   : > { %p1648_p5 = pnand %p1124_p4, %p62_p1  ;;  %s300_s25 = sshll.u32 %s1547_s24, 4  ;;  %s301_s25 = int_to_ptr.vmem [resolvable:$true] %s300_s25 }
  0x1a   : > { %s270_s14 = sshll.u32 %s1890_s3, 4  ;;  %s1058_s26 = sadd.s32 4294967294, %s1542_s10   ;;  %s271_s14 = int_to_ptr.hbm [resolvable:$true] %s270_s14 }
  0x1b   : > { %1127 = dma.hbm_to_vmem [thread:$0]  (!%p1648_p5), %s271_s14, 512, %s273_s17, [#allocation10], %s1872_s22, %s1872_s22, %s1874_s23  }
  0x1c   : > { %s298_s21 = sshll.u32 %s1893_s5, 4  ;;  %s41_s12 = sadd.s32 1, %s1538_s9  ;;  %s299_s21 = int_to_ptr.hbm [resolvable:$true] %s298_s21 }
  0x1d   : > { %1133 = dma.hbm_to_vmem [thread:$0]  (!%p1648_p5), %s299_s21, 512, %s301_s25, [#allocation13], %s1872_s22, %s1872_s22, %s1874_s23  }
  0x1e   : > { %p43_p7 = scmp.ge.s32.totalorder %s41_s12, 2  ;;  %s48_s13 = sadd.s32 1, %s1530_s29 }
  0x1f   : > { %p55_p8 = scmp.ne.s32.totalorder %s1530_s29, %s1526_s28  ;;  %p56_p9 = scmp.eq.s32.totalorder %s1542_s10, 0 }
  0x20   : > { %s1918_s12 = smov (%p43_p7, %s41_s12), 0  ;;  %p61_p11 = scmp.ne.s32.totalorder %s1526_s28, %s1522_s27 }
  0x21   : > { %1894 = sst [smem:[#allocation23_spill]] %s1918_s12  ;;  %p1674_p10 = por %p56_p9, %p55_p8 }
  0x22   : > { %s45_s16 = ssub.s32 %s1538_s9, %s1918_s12  ;;  %p246_p12 = scmp.eq.s32.totalorder %s1632_s11, 1 }
  0x23   : > { %p46_p13 = scmp.eq.s32.totalorder %s45_s16, 0  ;;  %p1685_p0 = por %p62_p1, %p61_p11 }
  0x24   : > { %p1689_p2 = por %p246_p12, %p55_p8  ;;  %p252_p4 = scmp.eq.s32.totalorder %s1058_s26, 1 }
  0x25   : > { %s1694_s20 = scalar_select %p46_p13, %s1530_s29, %s48_s13  }
  0x26   : > { %p1696_p7 = por %p252_p4, %p61_p11  ;;  %p1155_p9 = scmp.lt.s32.totalorder %s1542_s10, 2 }
  0x27   : > { %1898 = sst [smem:[#allocation24_spill]] %s1694_s20  ;;  %s1878_s24 = sand.u32 1, %s1530_s29  }
  0x28   : > { %s1899_s21 = scalar_select %p1696_p7, 1, 0 }
  0x29   : > { %s1703_s25 = sshll.u32 %s1538_s9, 3  ;;  %s1707_s16 = sshll.u32 %s1878_s24, 3 }
  0x2a   : > { %1900 = sst [smem:[#allocation25_spill]] %s1899_s21  ;;  %p1711_p8 = pnand %p1155_p9, %p1674_p10 }
  0x2b   : > { %s350_s26 = sand.u32 1, %s1542_s10   ;;  %s1902_s1 = sld [smem:[#allocation27_spill]] }
  0x2c   : > { %s354_s5 = scalar_lea.vmem [#allocation6], %s1707_s16  ;;  %s1903_s4 = sld [smem:[#allocation29_spill]] }
  0x2d   : > { %s362_s12 = sshll.u32 %s354_s5, 4  ;;  %s351_s21 = scalar_lea.sflag [#allocation7], %s350_s26  ;;  %s363_s12 = int_to_ptr.vmem [resolvable:$true] %s362_s12 }
  0x2e   : > { %s1548_s10 = smov [#allocation11]   ;;  %s1904_s6 = sld [smem:[#allocation31_spill]] }
  0x2f   : > { %s286_s23 = sshll.u32 %s1548_s10, 4  ;;  %s1905_s5 = smov 8   ;;  %s287_s23 = int_to_ptr.vmem [resolvable:$true] %s286_s23 }
  0x30   : > { %s1906_s24 = smov 128   ;;  %s1549_s26 = smov [#allocation14]  }
  0x31   : > { %s358_s3 = scalar_lea.hbm %s1902_s1, %s1703_s25  ;;  %s1907_s0 = sld [smem:[#allocation26_spill]] }
  0x32   : > { %s360_s9 = sshll.u32 %s358_s3, 4  ;;  %s284_s20 = sshll.u32 %s1903_s4, 4  ;;  %s361_s9 = int_to_ptr.hbm [resolvable:$true] %s360_s9  ;;  %s285_s20 = int_to_ptr.hbm [resolvable:$true] %s284_s20 }
  0x33   : > { %1143 = dma.hbm_to_vmem [thread:$0]  (!%p1711_p8), %s361_s9, 128, %s363_s12, %s351_s21  }
  0x34   : > { %s312_s3 = sshll.u32 %s1904_s6, 4  ;;  %s314_s9 = sshll.u32 %s1549_s26, 4  ;;  %s313_s3 = int_to_ptr.hbm [resolvable:$true] %s312_s3  ;;  %s315_s9 = int_to_ptr.vmem [resolvable:$true] %s314_s9 }
  0x35   : > { %1130 = dma.hbm_to_vmem [thread:$0]  (!%p1648_p5), %s285_s20, 512, %s287_s23, [#allocation10], %s1906_s24, %s1906_s24, %s1905_s5  }
  0x36   : > { %1136 = dma.hbm_to_vmem [thread:$0]  (!%p1648_p5), %s313_s3, 512, %s315_s9, [#allocation13], %s1906_s24, %s1906_s24, %s1905_s5  }
  0x37   : > { %s339_s10 = scalar_lea.hbm %s1907_s0, %s1703_s25  ;;  %s335_s13 = scalar_lea.vmem [#allocation3], %s1707_s16 }
  0x38   : > { %s341_s1 = sshll.u32 %s339_s10, 4  ;;  %s343_s4 = sshll.u32 %s335_s13, 4  ;;  %s342_s1 = int_to_ptr.hbm [resolvable:$true] %s341_s1  ;;  %s344_s4 = int_to_ptr.vmem [resolvable:$true] %s343_s4 }
  0x39   : > { %s1908_s6 = sand.u32 1, %s1530_s29   ;;  %s378_s12 = scalar_lea.hbm %s1865_s2, %s1703_s25 }
  0x3a   : > { %s332_s20 = scalar_lea.sflag [#allocation4], %s1908_s6  ;;  %s380_s14 = sshll.u32 %s378_s12, 4  ;;  %s381_s14 = int_to_ptr.hbm [resolvable:$true] %s380_s14 }
  0x3b   : > { %1140 = dma.hbm_to_vmem [thread:$0]  (!%p1711_p8), %s342_s1, 128, %s344_s4, %s332_s20  }
  0x3c   : > { %s373_s0 = scalar_lea.vmem [#allocation8], %s1707_s16  ;;  %391 = sbr.rel (%p1640_p3) target bundleno = 1116 (0x45c), region = 52 }
  0x3d   : > { %s382_s18 = sshll.u32 %s373_s0, 4  ;;  %s1758_s3 = sand.u32 (!%p1640_p3), 1, %s1526_s28   ;;  %s383_s18 = int_to_ptr.vmem [resolvable:$true] %s382_s18 }
  0x3e   : > { %1146 = dma.hbm_to_vmem [thread:$0]  (!%p1711_p8), %s381_s14, 128, %s383_s18, %s351_s21  }
  0x3f   : > { %s1761_s4 = sshll.u32 (!%p1640_p3), %s1758_s3, 3  ;;  %s394_s6 = scalar_lea.sflag (!%p1640_p3), [#allocation4], %s1758_s3 }
  0x40   : > { %s397_s25 = scalar_lea.vmem (!%p1640_p3), [#allocation3], %s1761_s4 }
  0x41   : > { %1501 = dma.done.wait (%p1685_p0), %s394_s6, 128  }
  0x42   : > { %1503 = vsyncadd (%p1685_p0), %s394_s6, 4294967168  ;;  %s403_s0 = sand.u32 1, %s1632_s11   ;;  %s407_s22 = scalar_lea.vmem [#allocation6], %s1761_s4 }
  0x43   : > { %s404_s15 = scalar_lea.sflag [#allocation7], %s403_s0 }
  0x44   : > { %1505 = dma.done.wait (%p1685_p0), %s404_s15, 256  }
  0x45   : > { %1507 = vsyncadd (%p1685_p0), %s404_s15, 4294967040  ;;  %s417_s21 = scalar_lea.vmem [#allocation8], %s1761_s4 }
  0x46   : > { %1509 = dma.done.wait (%p62_p1), [#allocation10], 1024  }
  0x47   : > { %1511 = vsyncadd (%p62_p1), [#allocation10], 4294966272 }
  0x48   : > { %1513 = dma.done.wait (%p62_p1), [#allocation13], 1024  }
  0x49   : > { %1515 = vsyncadd (%p62_p1), [#allocation13], 4294966272  ;;  %v491_v0 = vld [vmem:[#allocation11 + $0x18] sm:$0xff]  ;;  %v490_v2 = vld [vmem:[#allocation11 + $0x10] sm:$0xff]  ;;  %vm501_vm0 = vcmask 261120   ;;  %vm571_vm1 = vcmask 64512  }
  0x4a   : > { %v495_v1 = vld [vmem:[#allocation12 + $0x18] sm:$0xff]  ;;  %540 = vmatpush.msra.mxu1 %v491_v0  ;;  %v494_v3 = vld [vmem:[#allocation12 + $0x10] sm:$0xff]  ;;  %v489_v4 = vld [vmem:[#allocation11 + $0x8] sm:$0xff]  ;;  %s1550_s11 = smov 104   ;;  %s1551_s17 = smov 120   ;;  %vm705_vm2 = vcmask 130112  }
  0x4b   : > { %563 = vmatpush.msra.mxu2 %v495_v1  ;;  %v493_v5 = vld [vmem:[#allocation12 + $0x8] sm:$0xff]  ;;  %v488_v6 = vld [vmem:[#allocation11] sm:$0xff]  ;;  %v483_v9 = vld [vmem:[%s417_s21] sm:$0xff]  ;;  %s1552_s16 = smov 112   ;;  %s1553_s5 = smov 16   ;;  %vm777_vm3 = vcmask 195712  }
  0x4c   : > { %541 = vmatpush.msra.mxu1 %v490_v2  ;;  %v492_v7 = vld [vmem:[#allocation12] sm:$0xff]  ;;  %v487_v12 = vld [vmem:[#allocation9 + $0x18] sm:$0xff]  ;;  %v486_v13 = vld [vmem:[#allocation9 + $0x10] sm:$0xff]  ;;  %s1554_s24 = smov 8   ;;  %s1555_s9 = smov 24   ;;  %vm849_vm4 = vcmask 261312  }
  0x4d   : > { %564 = vmatpush.msra.mxu2 %v494_v3  ;;  %v482_v8 = vld [vmem:[%s407_s22] sm:$0xff]  ;;  %517 = vmatpush.msra.mxu0 %v487_v12  ;;  %v481_v16 = vld [vmem:[%s397_s25] sm:$0xff]  ;;  %s1097_s10 = sshll.u32 %s1534_s30, 3  ;;  %s480_s12 = scalar_lea.vmem [#allocation15], %s1761_s4 }
  0x4e   : > { %542 = vmatpush.msra.mxu1 %v489_v4  ;;  %v485_v14 = vld [vmem:[#allocation9 + $0x8] sm:$0xff]  ;;  %v484_v15 = vld [vmem:[#allocation9] sm:$0xff]  ;;  %v498_v12 = vld [vmem:[#allocation14 + $0x10] sm:$0xff]  ;;  %s891_s20 = scalar_lea.hbm %s1871_s8, %s1097_s10  ;;  %s893_s14 = sshll.u32 %s480_s12, 4  ;;  %s894_s14 = int_to_ptr.vmem [resolvable:$true] %s893_s14 }
  0x4f   : > { %565 = vmatpush.msra.mxu2 %v493_v5  ;;  %518 = vmatpush.msra.mxu0 %v486_v13  ;;  %v497_v13 = vld [vmem:[#allocation14 + $0x8] sm:$0xff]  ;;  %s895_s18 = sshll.u32 %s891_s20, 4  ;;  %s880_s6 = scalar_lea.sflag [#allocation5], %s1758_s3  ;;  %s896_s18 = int_to_ptr.hbm [resolvable:$true] %s895_s18 }
  0x50   : > { %543 = vmatpush.msra.mxu1 %v488_v6  ;;  %s1462_s30 = sshra.s32 %s896_s18, 4  ;;  %s1468_s4 = scalar_lea.hbm %s1871_s8, 16  ;;  %s1463_s30 = int_to_ptr.hbm [resolvable:$true] %s1462_s30 }
  0x51   : > { %566 = vmatpush.msra.mxu2 %v492_v7  ;;  %1081 = vmatmul.msk.f32.vlgmr.msra.gmra.mxu1 %vm501_vm0, %v482_v8  ;;  %s1464_s25 = scalar_lea.hbm %s1463_s30, 8  ;;  %p1469_p10 = scmp.lt.s32.totalorder %s1463_s30, %s1871_s8 }
  0x52   : > { %1082 = vmatmul.msk.f32.vlgmr.msra.gmra.mxu2 %vm501_vm0, %v483_v9  ;;  %519 = vmatpush.msra.mxu0 %v485_v14  ;;  %v496_v14 = vld [vmem:[#allocation14] sm:$0xff]  ;;  %p1465_p1 = scmp.ne.s32.totalorder %s1463_s30, %s1464_s25  ;;  %p1470_p11 = scmp.lt.s32.totalorder %s1468_s4, %s1464_s25 }
  0x54   : > { %520 = vmatpush.msra.mxu0 %v484_v15  ;;  %p1466_p3 = pnand %p1465_p1, %p1689_p2  ;;  %p1471_p12 = por %p1470_p11, %p1469_p10 }
  0x55   : > { %1080 = vmatmul.msk.f32.vlgmr.msra.gmra.mxu0 %vm501_vm0, %v481_v16 }
  0x56   : > { %p1467_p5 = pneg %p1466_p3 }
  0x58   : > { %p1472_p13 = pnand %p1471_p12, %p1467_p5 }
  0xce   : > { %v545_v10 = vpop.f32.mrf.mxu1 }
  0xcf   : > { %781 = vrot.lane.b32.xlu2 %v545_v10, %s1550_s11  ;;  %636 = vrot.lane.b32.xlu1 %v545_v10, %s1551_s17 }
  0xd0   : > { %709 = vrot.lane.b32.xlu0 %v545_v10, %s1552_s16  ;;  %1083 = vmatpush.xpose.msk.msra.mxu3 %vm571_vm1, %v545_v10 }
  0xd2   : > { %v522_v26 = vpop.f32.mrf.mxu0 }
  0xd4   : > { %628 = vmatpush.msrb.mxu3 %v522_v26 }
  0xd5   : > { %v568_v11 = vpop.f32.mrf.mxu2 }
  0xd6   : > { %1084 = vmatmul.msk.f32.vlgmr.msra.gmra.mxu3 %vm571_vm1, %v568_v11 }
  0xd7   : > { %779 = vrot.lane.b32.xlu2 %v568_v11, %s1550_s11  ;;  %634 = vrot.lane.b32.xlu1 %v568_v11, %s1551_s17 }
  0xd8   : > { %707 = vrot.lane.b32.xlu0 %v568_v11, %s1552_s16  ;;  %v499_v11 = vld [vmem:[#allocation14 + $0x18] sm:$0xff] }
 0x129   : > { %v782_v18 = vpop.permute.xlu2 %781 }
 0x131   : > { %v780_v22 = vpop.permute.xlu2 %779 }
 0x141   : > { %v637_v17 = vpop.permute.xlu1 %636 }
 0x142   : > { %v710_v19 = vpop.permute.xlu0 %709  ;;  %1086 = vmatpush.xpose.msk.msrb.mxu0 %vm571_vm1, %v637_v17 }
 0x143   : > { %1089 = vmatpush.xpose.msk.msrb.mxu2 %vm571_vm1, %v710_v19  ;;  %v1221_v19 = vld [vmem:[%s1870_s7] ss:$0 sm:$0xff] }
 0x146   : > { %1092 = vmatpush.xpose.msk.msra.mxu0 %vm571_vm1, %v782_v18 }
 0x147   : > { %870 = vmatpush.msra.mxu2 %v499_v11 }
 0x149   : > { %v635_v20 = vpop.permute.xlu1 %634  ;;  %871 = vmatpush.msra.mxu2 %v498_v12 }
 0x14a   : > { %v708_v21 = vpop.permute.xlu0 %707  ;;  %1087 = vmatmul.msk.f32.vlgmr.msrb.gmra.mxu0 %vm571_vm1, %v635_v20 }
 0x14b   : > { %1090 = vmatmul.msk.f32.vlgmr.msrb.gmra.mxu2 %vm571_vm1, %v708_v21 }
 0x14c   : > { %872 = vmatpush.msra.mxu2 %v497_v13 }
 0x14e   : > { %873 = vmatpush.msra.mxu2 %v496_v14 }
 0x152   : > { %1093 = vmatmul.msk.f32.vlgmr.msra.gmra.mxu0 %vm571_vm1, %v780_v22 }
 0x159   : > { %v595_v23 = vpop.f32.mrf.mxu3 }
 0x15a   : > { %v598_v24 = vmul.f32 0.17677669, %v595_v23 }
 0x15c   : > { %v599_v25 = vsel %vm571_vm1, %v598_v24, -inf }
 0x15d   : > { %600 = vmax.xlane.f32.xlu0 %v599_v25 }
 0x1c7   : > { %v659_v27 = vpop.f32.mrf.mxu0 }
 0x1c8   : > { %v662_v28 = vmul.f32 0.17677669, %v659_v27 }
 0x1ca   : > { %v663_v29 = vsel %vm571_vm1, %v662_v28, -inf }
 0x1cb   : > { %664 = vmax.xlane.f32.xlu1 %v663_v29 }
 0x1ce   : > { %v732_v30 = vpop.f32.mrf.mxu2 }
 0x1cf   : > { %v735_v31 = vmul.f32 0.17677669, %v732_v30  ;;  %v804_v36 = vpop.f32.mrf.mxu0 }
 0x1d0   : > { %v601_v32 = vpop.xlane.xlu0 %600  ;;  %v807_v37 = vmul.f32 0.17677669, %v804_v36 }
 0x1d1   : > { %v602_v33 = vsub.f32 %v598_v24, %v601_v32  ;;  %v736_v34 = vsel %vm571_vm1, %v735_v31, -inf }
 0x1d2   : > { %737 = vmax.xlane.f32.xlu2 %v736_v34  ;;  %v808_v38 = vsel %vm571_vm1, %v807_v37, -inf }
 0x1d3   : > { %v603_v35 = vmul.f32 1.442695, %v602_v33 }
 0x1d5   : > { %1222 = vpow2.f32 %v603_v35 }
 0x1da   : > { %809 = vmax.xlane.f32.xlu2 %v808_v38 }
 0x1db   : > { %v1223_v39 = vpop.eup %1222 }
 0x1dc   : > { %v605_v40 = vsel %vm571_vm1, %v1223_v39, 0.0 }
 0x1dd   : > { %606 = vadd.xlane.f32.xlu0 %v605_v40 }
 0x23e   : > { %v665_v41 = vpop.xlane.xlu1 %664 }
 0x23f   : > { %v666_v42 = vsub.f32 %v662_v28, %v665_v41 }
 0x241   : > { %v667_v43 = vmul.f32 1.442695, %v666_v42 }
 0x243   : > { %1224 = vpow2.f32 %v667_v43 }
 0x245   : > { %v738_v44 = vpop.xlane.xlu2 %737 }
 0x246   : > { %v739_v45 = vsub.f32 %v735_v31, %v738_v44 }
 0x248   : > { %v740_v46 = vmul.f32 1.442695, %v739_v45 }
 0x249   : > { %v1225_v47 = vpop.eup %1224 }
 0x24a   : > { %1226 = vpow2.f32 %v740_v46  ;;  %v669_v48 = vsel %vm571_vm1, %v1225_v47, 0.0 }
 0x24b   : > { %670 = vadd.xlane.f32.xlu1 %v669_v48 }
 0x24d   : > { %v810_v49 = vpop.xlane.xlu2 %809 }
 0x24e   : > { %v811_v50 = vsub.f32 %v807_v37, %v810_v49 }
 0x250   : > { %v607_v51 = vpop.xlane.xlu0 %606  ;;  %v1227_v52 = vpop.eup %1226  ;;  %v812_v53 = vmul.f32 1.442695, %v811_v50 }
 0x251   : > { %1228 = vrcp.f32 %v607_v51  ;;  %v742_v54 = vsel %vm571_vm1, %v1227_v52, 0.0 }
 0x252   : > { %1230 = vpow2.f32 %v812_v53  ;;  %743 = vadd.xlane.f32.xlu2 %v742_v54 }
 0x257   : > { %v1229_v55 = vpop.eup %1228 }
 0x258   : > { %v609_v56 = vmul.f32 %v1229_v55, %v1223_v39  ;;  %v1231_v57 = vpop.eup %1230 }
 0x259   : > { %v814_v58 = vsel %vm571_vm1, %v1231_v57, 0.0 }
 0x25a   : > { %1085 = vmatmul.msk.f32.vlgmr.msrb.gmra.mxu3 %vm571_vm1, %v609_v56  ;;  %815 = vadd.xlane.f32.xlu0 %v814_v58 }
 0x264   : > { %675 = vrot.lane.b32.xlu1 %v522_v26, %s1551_s17 }
 0x26a   : > { %747 = vrot.lane.b32.xlu2 %v522_v26, %s1552_s16 }
 0x26e   : > { %819 = vrot.lane.b32.xlu0 %v522_v26, %s1550_s11 }
 0x2be   : > { %v671_v60 = vpop.xlane.xlu1 %670 }
 0x2c5   : > { %v744_v59 = vpop.xlane.xlu2 %743 }
 0x2c6   : > { %1232 = vrcp.f32 %v744_v59 }
 0x2c7   : > { %1234 = vrcp.f32 %v671_v60 }
 0x2cc   : > { %v1233_v61 = vpop.eup %1232 }
 0x2cd   : > { %v746_v62 = vmul.f32 %v1233_v61, %v1227_v52  ;;  %v748_v63 = vpop.permute.xlu2 %747  ;;  %v1235_v0 = vpop.eup %1234 }
 0x2ce   : > { %768 = vmatpush.msra.mxu3 %v748_v63  ;;  %v816_v1 = vpop.xlane.xlu0 %815  ;;  %v673_v3 = vmul.f32 %v1235_v0, %v1225_v47 }
 0x2cf   : > { %1091 = vmatmul.msk.f32.vlgmr.msra.gmra.mxu3 %vm571_vm1, %v746_v62  ;;  %1236 = vrcp.f32 %v816_v1 }
 0x2d5   : > { %v1237_v5 = vpop.eup %1236 }
 0x2d6   : > { %v676_v2 = vpop.permute.xlu1 %675  ;;  %v818_v6 = vmul.f32 %v1237_v5, %v1231_v57 }
 0x2d7   : > { %696 = vmatpush.msrb.mxu1 %v676_v2 }
 0x2d8   : > { %1088 = vmatmul.msk.f32.vlgmr.msrb.gmra.mxu1 %vm571_vm1, %v673_v3 }
 0x2dd   : > { %v630_v4 = vpop.f32.mrf.mxu3 }
 0x2de   : > { %633 = vst.msk [vmem:[#allocation2] sm:$0xff] %vm571_vm1, %v630_v4 }
 0x2e0   : > { %v820_v7 = vpop.permute.xlu0 %819 }
 0x2e1   : > { %840 = vmatpush.msra.mxu1 %v820_v7 }
 0x2e2   : > { %1094 = vmatmul.msk.f32.vlgmr.msra.gmra.mxu1 %vm571_vm1, %v818_v6 }
 0x352   : > { %v770_v8 = vpop.f32.mrf.mxu3 }
 0x353   : > { %774 = vrot.lane.b32.xlu0 %v770_v8, %s1553_s5 }
 0x355   : > { %v698_v9 = vpop.f32.mrf.mxu1 }
 0x356   : > { %702 = vrot.lane.b32.xlu1 %v698_v9, %s1554_s24 }
 0x35f   : > { %v842_v10 = vpop.f32.mrf.mxu1 }
 0x360   : > { %846 = vrot.lane.b32.xlu2 %v842_v10, %s1555_s9 }
 0x3ba   : > { %v847_v17 = vpop.permute.xlu2 %846 }
 0x3c5   : > { %v775_v16 = vpop.permute.xlu0 %774 }
 0x3c8   : > { %v703_v15 = vpop.permute.xlu1 %702 }
 0x3c9   : > { %706 = vst.msk [vmem:[#allocation2] sm:$0xff] %vm705_vm2, %v703_v15 }
 0x3ca   : > { %778 = vst.msk [vmem:[#allocation2] sm:$0xff] %vm777_vm3, %v775_v16 }
 0x3cb   : > { %850 = vst.msk [vmem:[#allocation2] sm:$0xff] %vm849_vm4, %v847_v17 }
 0x3d2   : > { %v851_v18 = vld [vmem:[#allocation2] sm:$0xff] }
 0x3d3   : > { %1095 = vmatmul.msk.f32.vlgmr.msra.gmra.mxu2 %vm501_vm0, %v851_v18 }
 0x456   : > { %v875_v20 = vpop.f32.mrf.mxu2 }
 0x457   : > { %v876_v21 = vadd.f32 %v1221_v19, %v875_v20 }
 0x459   : > { %878 = vst.msk [vmem:[%s480_s12] sm:$0xff] %vm501_vm0, %v876_v21 }
 0x45a   : > { %1475 = shalt.err (!%p1472_p13)
}
 0x45b   : > { %1122 = dma.vmem_to_hbm [thread:$0]  (%p1689_p2), %s894_s14, 128, %s896_s18, %s880_s6  }
 0x45c PF: > { %s1910_s11 = sld [smem:[#allocation22_spill]]  ;;  %s907_s17 = sand.u32 1, %s1522_s27  }
 0x45d   : > { %p1148_p0 = pnand %p1064_p6, %p1696_p7  ;;  %s908_s16 = scalar_lea.sflag [#allocation5], %s907_s17 }
 0x45f   : > { %p1149_p4 = pneg %p1148_p0 }
 0x461   : > { %1517 = dma.done.wait (%p1149_p4), %s908_s16, 128  }
 0x462   : > { %1519 = vsyncadd (%p1149_p4), %s908_s16, 4294967168  ;;  %s29_s10 = sadd.s32 1, %s1910_s11   ;;  %s1911_s5 = sld [smem:[#allocation24_spill]] }
 0x463   : > { %p26_p9 = scmp.ge.s32.totalorder %s29_s10, 4   ;;  %s1912_s30 = sld [smem:[#allocation21_spill]] }
 0x464   : > { %s1913_s9 = sld [smem:[#allocation23_spill]]  ;;  %s1914_s27 = smov %s1526_s28 }
 0x465   : > { %s1915_s28 = smov %s1530_s29  ;;  %28 = sbr.rel (!%p26_p9) target bundleno = 17 (0x11), region = 137 }
 0x468   : > { %s1916_s29 = smov %s1911_s5 }
 0x46a   :  { %914 = vsyncpa [#allocation4], 1 }
 0x46b   :  { %916 = vsyncpa [#allocation4 + $0x1], 1 }
 0x46c   :  { %917 = vsyncpa [#allocation7], 1 }
 0x46d   :  { %919 = vsyncpa [#allocation7 + $0x1], 1 }
 0x46e   :  { %920 = vsyncpa [#allocation10], 1 }
 0x46f   :  { %921 = vsyncpa [#allocation13], 1 }
 0x470   :  { %922 = vsyncpa [#allocation5], 1 }
 0x471   :  { %924 = vsyncpa [#allocation5 + $0x1], 1 }

</bundles_post_ra>
